<compile_context>
chip_gen: v7x
topology: tpu7x:2x2x1
jax: 0.10.0
libtpu: 0.0.40
codegen_flags: <defaults>
</compile_context>

<pallas_src>
import functools
import math

import jax
import jax.numpy as jnp
from jax import lax
from jax.experimental import pallas as pl
from jax.experimental.pallas import tpu as pltpu

_SQRT1_2 = 0.7071067811865476   # 1/sqrt(2) for exact (erf) GELU
_LANE = 128
_SUBLANE = 8


def _round_up(v, m):
    return -(-v // m) * m


# ----------------------------------------------------------------------------
# Fused MLP kernel: one call does every Linear (+GELU on hidden layers).
# refs = (x_ref, w0, b0, w1, b1, ..., w_{L-1}, b_{L-1}, out_ref)
# ----------------------------------------------------------------------------
def _mlp_kernel(*refs, num_layers: int):
    x_ref = refs[0]
    o_ref = refs[-1]
    wb = refs[1:-1]

    h = x_ref[...]
    for i in range(num_layers):
        w = wb[2 * i][...]          # (Din_i, Dout_i)
        b = wb[2 * i + 1][...]      # (1, Dout_i)
        h = jnp.dot(h, w, preferred_element_type=jnp.float32) + b
        if i < num_layers - 1:
            # Exact (erf-based) GELU — matches torch.nn.GELU() default.
            h = 0.5 * h * (1.0 + lax.erf(h * jnp.float32(_SQRT1_2)))
    o_ref[...] = h.astype(o_ref.dtype)


# ----------------------------------------------------------------------------
# Params: init mimics nn.Linear's U(-1/sqrt(fan_in), 1/sqrt(fan_in)).
# pack_params() reshapes biases to (1, Dout) and zero-pads the last layer's
# output features to a multiple of 128 lanes (done ONCE, not per forward).
# ----------------------------------------------------------------------------
def init_mlp_params(layers, key):
    params = []
    for i in range(len(layers) - 1):
        fan_in, fan_out = layers[i], layers[i + 1]
        key, kw, kb = jax.random.split(key, 3)
        bound = 1.0 / math.sqrt(fan_in)
        w = jax.random.uniform(kw, (fan_in, fan_out), jnp.float32, -bound, bound)
        b = jax.random.uniform(kb, (fan_out,), jnp.float32, -bound, bound)
        params.append((w, b))
    return params


def pack_params(params):
    """Kernel-ready flat tuple (w0, b0, w1, b1, ...) with padded last layer."""
    n = len(params)
    flat = []
    for i, (w, b) in enumerate(params):
        if i == n - 1:
            dout = w.shape[1]
            dpad = _round_up(dout, _LANE)
            if dpad != dout:
                w = jnp.pad(w, ((0, 0), (0, dpad - dout)))
                b = jnp.pad(b, (0, dpad - dout))
        flat.append(w)
        flat.append(b.reshape(1, -1))
    return tuple(flat)


# ----------------------------------------------------------------------------
# Forward pass: single fused pallas_call, everything resident in VMEM.
# ----------------------------------------------------------------------------
@functools.partial(jax.jit, static_argnames=("num_layers", "out_features"))
def _forward_jit(x, packed_params, *, num_layers, out_features):
    B, _ = x.shape
    b_pad = _round_up(B, _SUBLANE)
    if b_pad != B:
        x = jnp.pad(x, ((0, b_pad - B), (0, 0)))

    padded_out = packed_params[-1].shape[1]      # last bias (1, Dout_pad)
    n_inputs = 1 + 2 * num_layers
    kernel = functools.partial(_mlp_kernel, num_layers=num_layers)

    y = pl.pallas_call(
        kernel,
        out_shape=jax.ShapeDtypeStruct((b_pad, padded_out), jnp.float32),
        # No grid: whole (tiny) problem lives in VMEM for the single invocation.
        in_specs=[pl.BlockSpec(memory_space=pltpu.MemorySpace.VMEM)] * n_inputs,
        out_specs=pl.BlockSpec(memory_space=pltpu.MemorySpace.VMEM),
    )(x, *packed_params)

    return y[:B, :out_features]


def nn_forward(x, packed_params, out_features):
    """Forward pass of NN: GELU on all hidden layers, no activation on last."""
    num_layers = len(packed_params) // 2
    return _forward_jit(
        x, packed_params, num_layers=num_layers, out_features=out_features
    )


if __name__ == "__main__":
    key = jax.random.PRNGKey(0)
    kx, kp = jax.random.split(key)

    # Small MLP consistent with `fit(layers=...)`: layers = [32, 64, 64, 8]
    layers = [32, 64, 64, 8]
    batch = 8

    x = jax.random.normal(kx, (batch, layers[0]), dtype=jnp.float32)
    params = init_mlp_params(layers, kp)
    packed = pack_params(params)

    out = nn_forward(x, packed, out_features=layers[-1])
    out = jax.block_until_ready(out)

    # Sanity check against plain-JAX reference (uses the raw, unpadded params).
    ref = x
    for i, (w, b) in enumerate(params):
        ref = ref @ w + b
        if i < len(params) - 1:
            ref = 0.5 * ref * (1.0 + lax.erf(ref * jnp.float32(_SQRT1_2)))

    assert out.shape == (batch, layers[-1])
    assert jnp.allclose(out, ref, atol=1e-4, rtol=1e-4)

    print("KERNEL_OK")
</pallas_src>

<mosaic_0001>
module attributes {stable_mosaic.version = 11 : i64} {
  func.func @_mlp_kernel(%arg0: memref<8x32xf32, #tpu.memory_space<vmem>>, %arg1: memref<32x64xf32, #tpu.memory_space<vmem>>, %arg2: memref<1x64xf32, #tpu.memory_space<vmem>>, %arg3: memref<64x64xf32, #tpu.memory_space<vmem>>, %arg4: memref<1x64xf32, #tpu.memory_space<vmem>>, %arg5: memref<64x128xf32, #tpu.memory_space<vmem>>, %arg6: memref<1x128xf32, #tpu.memory_space<vmem>>, %arg7: memref<8x128xf32, #tpu.memory_space<vmem>>) attributes {dimension_semantics = [], scalar_prefetch = 0 : i64, scratch_operands = 0 : i64, tpu.core_type = #tpu.core_type<tc>} {
    %c0 = arith.constant 0 : index
    %c0_0 = arith.constant 0 : index
    %0 = vector.load %arg0[%c0, %c0_0] : memref<8x32xf32, #tpu.memory_space<vmem>>, vector<8x32xf32>
    %c0_1 = arith.constant 0 : index
    %c0_2 = arith.constant 0 : index
    %1 = vector.load %arg1[%c0_1, %c0_2] : memref<32x64xf32, #tpu.memory_space<vmem>>, vector<32x64xf32>
    %c0_3 = arith.constant 0 : index
    %c0_4 = arith.constant 0 : index
    %2 = vector.load %arg2[%c0_3, %c0_4] : memref<1x64xf32, #tpu.memory_space<vmem>>, vector<1x64xf32>
    %cst = arith.constant dense<0.000000e+00> : vector<8x64xf32>
    %3 = tpu.matmul %0, %1, %cst {dimension_numbers = #tpu.dot_dimension_numbers<[1], [0], [0], [1], [0, 0, 1, 1], [], []>} : vector<8x32xf32>, vector<32x64xf32>, vector<8x64xf32> -> vector<8x64xf32>
    %4 = vector.broadcast %2 : vector<1x64xf32> to vector<8x64xf32>
    %5 = arith.addf %3, %4 : vector<8x64xf32>
    %cst_5 = arith.constant 5.000000e-01 : f32
    %6 = vector.broadcast %cst_5 : f32 to vector<8x64xf32>
    %7 = arith.mulf %6, %5 : vector<8x64xf32>
    %cst_6 = arith.constant 0.707106769 : f32
    %8 = vector.broadcast %cst_6 : f32 to vector<8x64xf32>
    %9 = arith.mulf %5, %8 : vector<8x64xf32>
    %10 = math.erf %9 : vector<8x64xf32>
    %cst_7 = arith.constant 1.000000e+00 : f32
    %11 = vector.broadcast %cst_7 : f32 to vector<8x64xf32>
    %12 = arith.addf %11, %10 : vector<8x64xf32>
    %13 = arith.mulf %7, %12 : vector<8x64xf32>
    %c0_8 = arith.constant 0 : index
    %c0_9 = arith.constant 0 : index
    %14 = vector.load %arg3[%c0_8, %c0_9] : memref<64x64xf32, #tpu.memory_space<vmem>>, vector<64x64xf32>
    %c0_10 = arith.constant 0 : index
    %c0_11 = arith.constant 0 : index
    %15 = vector.load %arg4[%c0_10, %c0_11] : memref<1x64xf32, #tpu.memory_space<vmem>>, vector<1x64xf32>
    %cst_12 = arith.constant dense<0.000000e+00> : vector<8x64xf32>
    %16 = tpu.matmul %13, %14, %cst_12 {dimension_numbers = #tpu.dot_dimension_numbers<[1], [0], [0], [1], [0, 0, 1, 1], [], []>} : vector<8x64xf32>, vector<64x64xf32>, vector<8x64xf32> -> vector<8x64xf32>
    %17 = vector.broadcast %15 : vector<1x64xf32> to vector<8x64xf32>
    %18 = arith.addf %16, %17 : vector<8x64xf32>
    %cst_13 = arith.constant 5.000000e-01 : f32
    %19 = vector.broadcast %cst_13 : f32 to vector<8x64xf32>
    %20 = arith.mulf %19, %18 : vector<8x64xf32>
    %cst_14 = arith.constant 0.707106769 : f32
    %21 = vector.broadcast %cst_14 : f32 to vector<8x64xf32>
    %22 = arith.mulf %18, %21 : vector<8x64xf32>
    %23 = math.erf %22 : vector<8x64xf32>
    %cst_15 = arith.constant 1.000000e+00 : f32
    %24 = vector.broadcast %cst_15 : f32 to vector<8x64xf32>
    %25 = arith.addf %24, %23 : vector<8x64xf32>
    %26 = arith.mulf %20, %25 : vector<8x64xf32>
    %c0_16 = arith.constant 0 : index
    %c0_17 = arith.constant 0 : index
    %27 = vector.load %arg5[%c0_16, %c0_17] : memref<64x128xf32, #tpu.memory_space<vmem>>, vector<64x128xf32>
    %c0_18 = arith.constant 0 : index
    %c0_19 = arith.constant 0 : index
    %28 = vector.load %arg6[%c0_18, %c0_19] : memref<1x128xf32, #tpu.memory_space<vmem>>, vector<1x128xf32>
    %cst_20 = arith.constant dense<0.000000e+00> : vector<8x128xf32>
    %29 = tpu.matmul %26, %27, %cst_20 {dimension_numbers = #tpu.dot_dimension_numbers<[1], [0], [0], [1], [0, 0, 1, 1], [], []>} : vector<8x64xf32>, vector<64x128xf32>, vector<8x128xf32> -> vector<8x128xf32>
    %30 = vector.broadcast %28 : vector<1x128xf32> to vector<8x128xf32>
    %31 = arith.addf %29, %30 : vector<8x128xf32>
    %c0_21 = arith.constant 0 : index
    %c0_22 = arith.constant 0 : index
    %32 = vector.load %arg7[%c0_21, %c0_22] : memref<8x128xf32, #tpu.memory_space<vmem>>, vector<8x128xf32>
    tpu.vector_store %arg7[%c0_21, %c0_22], %31 {strides = array<i32>} : memref<8x128xf32, #tpu.memory_space<vmem>>, vector<8x128xf32>,
    return
  }
}

</mosaic_0001>

<bundles_post_ra>
// kernel: _forward_jit.1
= control target key start
LH: loop header
LB: loop body
LE: loop exit
PB: predicated region body
PF: predicated region fallthrough
CT: control target
= control target key end

     0   :  { %12 = vsyncpa [#allocation3], 0  ;;  %s754_s0 = inlined_call_operand.hbm [shape: f32[8,32], index: 0, kind: input, shape index: {}]   ;;  %s755_s1 = inlined_call_operand.hbm [shape: f32[32,64], index: 1, kind: input, shape index: {}]   ;;  %s756_s2 = inlined_call_operand.vmem [shape: f32[1,64], index: 2, kind: input, shape index: {}]   ;;  %s757_s3 = inlined_call_operand.hbm [shape: f32[64,64], index: 3, kind: input, shape index: {}]   ;;  %s758_s4 = inlined_call_operand.vmem [shape: f32[1,64], index: 4, kind: input, shape index: {}]   ;;  %s759_s5 = inlined_call_operand.hbm [shape: f32[64,128], index: 5, kind: input, shape index: {}]   ;;  %s760_s6 = inlined_call_operand.vmem [shape: f32[1,128], index: 6, kind: input, shape index: {}]   ;;  %s761_s7 = inlined_call_operand.hbm [shape: f32[8,128], index: 7, kind: output, shape index: {}]  }
   0x1   :  { %13 = vsyncpa [#allocation6], 0 }
   0x2   :  { %14 = vsyncpa [#allocation9], 0 }
   0x3   :  { %15 = vsyncpa [#allocation4], 0  ;;  %s611_s24 = smov [#allocation5]   ;;  %s493_s28 = scalar_lea.hbm %s755_s1, 512 }
   0x4   :  { %s31_s25 = sshll.u32 %s611_s24, 4  ;;  %p494_p0 = scmp.ne.s32.totalorder %s755_s1, %s493_s28  ;;  %s32_s25 = int_to_ptr.vmem [resolvable:$true] %s31_s25 }
   0x5   :  { %p497_p1 = scmp.lt.u32.totalorder %s493_s28, %s755_s1 }
   0x7   :  { %p499_p2 = pnand %p497_p1, %p494_p0 }
   0x9   :  { %502 = shalt.err (!%p499_p2)
}
   0xa   :  { %s503_s10 = scalar_lea.vmem %s32_s25, 512  ;;  %p508_p4 = scmp.lt.s32.totalorder %s32_s25, %s32_s25 }
   0xb   :  { %p504_p3 = scmp.ne.s32.totalorder %s32_s25, %s503_s10  ;;  %p509_p5 = scmp.lt.s32.totalorder %s503_s10, %s503_s10 }
   0xd   :  { %p510_p6 = por %p509_p5, %p508_p4 }
   0xf   :  { %p511_p7 = pnand %p510_p6, %p504_p3 }
  0x11   :  { %514 = shalt.err (!%p511_p7)
}
  0x12   :  { %s612_s11 = smov 128   ;;  %s613_s12 = smov 8  }
  0x13   :  { %37 = dma.hbm_to_vmem [thread:$0]  %s755_s1, 512, %s32_s25, [#allocation6], %s612_s11, %s612_s11, %s613_s12  }
  0x14   :  { %s614_s15 = smov [#allocation2]   ;;  %s615_s17 = smov [#allocation7]  }
  0x15   :  { %s22_s16 = sshll.u32 %s614_s15, 4  ;;  %s45_s18 = sshll.u32 %s615_s17, 4  ;;  %s23_s16 = int_to_ptr.vmem [resolvable:$true] %s22_s16  ;;  %s46_s18 = int_to_ptr.vmem [resolvable:$true] %s45_s18 }
  0x16   :  { %s515_s21 = scalar_lea.hbm %s754_s0, 128 }
  0x17   :  { %p516_p8 = scmp.ne.s32.totalorder %s754_s0, %s515_s21  ;;  %p519_p9 = scmp.lt.u32.totalorder %s515_s21, %s754_s0 }
  0x19   :  { %p521_p10 = pnand %p519_p9, %p516_p8 }
  0x1b   :  { %524 = shalt.err (!%p521_p10)
}
  0x1c   :  { %s525_s1 = scalar_lea.vmem %s23_s16, 128  ;;  %p530_p12 = scmp.lt.s32.totalorder %s23_s16, %s23_s16 }
  0x1d   :  { %p526_p11 = scmp.ne.s32.totalorder %s23_s16, %s525_s1  ;;  %p531_p13 = scmp.lt.s32.totalorder %s525_s1, %s525_s1 }
  0x1f   :  { %p532_p0 = por %p531_p13, %p530_p12 }
  0x21   :  { %p533_p1 = pnand %p532_p0, %p526_p11 }
  0x23   :  { %536 = shalt.err (!%p533_p1)
}
  0x24   :  { %25 = dma.hbm_to_vmem [thread:$0]  %s754_s0, 128, %s23_s16, [#allocation3]  }
  0x25   :  { %s537_s30 = scalar_lea.hbm %s757_s3, 1024 }
  0x26   :  { %p538_p2 = scmp.ne.s32.totalorder %s757_s3, %s537_s30  ;;  %p541_p3 = scmp.lt.u32.totalorder %s537_s30, %s757_s3 }
  0x28   :  { %p543_p4 = pnand %p541_p3, %p538_p2 }
  0x2a   :  { %546 = shalt.err (!%p543_p4)
}
  0x2b   :  { %s547_s14 = scalar_lea.vmem %s46_s18, 1024  ;;  %p552_p6 = scmp.lt.s32.totalorder %s46_s18, %s46_s18 }
  0x2c   :  { %p548_p5 = scmp.ne.s32.totalorder %s46_s18, %s547_s14  ;;  %p553_p7 = scmp.lt.s32.totalorder %s547_s14, %s547_s14 }
  0x2e   :  { %p554_p8 = por %p553_p7, %p552_p6 }
  0x30   :  { %p555_p9 = pnand %p554_p8, %p548_p5 }
  0x32   :  { %558 = shalt.err (!%p555_p9)
}
  0x33   :  { %51 = dma.hbm_to_vmem [thread:$0]  %s757_s3, 1024, %s46_s18, [#allocation6], %s612_s11, %s612_s11, %s613_s12  }
  0x34   :  { %s616_s16 = smov [#allocation8]   ;;  %s559_s21 = scalar_lea.hbm %s759_s5, 1024 }
  0x35   :  { %s59_s17 = sshll.u32 %s616_s16, 4  ;;  %p560_p10 = scmp.ne.s32.totalorder %s759_s5, %s559_s21  ;;  %s60_s17 = int_to_ptr.vmem [resolvable:$true] %s59_s17 }
  0x36   :  { %p563_p11 = scmp.lt.u32.totalorder %s559_s21, %s759_s5 }
  0x38   :  { %p565_p12 = pnand %p563_p11, %p560_p10 }
  0x3a   :  { %568 = shalt.err (!%p565_p12)
}
  0x3b   :  { %s569_s1 = scalar_lea.vmem %s60_s17, 1024  ;;  %p574_p0 = scmp.lt.s32.totalorder %s60_s17, %s60_s17 }
  0x3c   :  { %p570_p13 = scmp.ne.s32.totalorder %s60_s17, %s569_s1  ;;  %p575_p1 = scmp.lt.s32.totalorder %s569_s1, %s569_s1 }
  0x3e   :  { %p576_p2 = por %p575_p1, %p574_p0 }
  0x40   :  { %p577_p3 = pnand %p576_p2, %p570_p13 }
  0x42   :  { %580 = shalt.err (!%p577_p3)
}
  0x43   :  { %65 = dma.hbm_to_vmem [thread:$0]  %s759_s5, 1024, %s60_s17, [#allocation9], %s612_s11, %s612_s11, %s613_s12  }
  0x44   :  { %603 = dma.done.wait [#allocation3], 128  }
  0x45   :  { %604 = vsyncadd [#allocation3], 4294967168 }
  0x46   :  { %605 = dma.done.wait [#allocation6], 1536  }
  0x47   :  { %606 = vsyncadd [#allocation6], 4294965760 }
  0x48   :  { %607 = dma.done.wait [#allocation9], 1024  }
  0x49   :  { %608 = vsyncadd [#allocation9], 4294966272  ;;  %v617_v0 = vmov 0.0|0.0   ;;  %vm618_vm0 = vmmov 0   ;;  %v619_v1 = vmov 0.0   ;;  %v81_v2 = vld [vmem:[#allocation5] sm:$0xff] }
  0x4a   :  { %449 = vmatprep.subr.bf16.mxu0 %v617_v0  ;;  %408 = vmatprep.mubr.msk.f32.mxu0 %vm618_vm0, %v619_v1  ;;  %v82_v3 = vld [vmem:[#allocation5 + $0x8] sm:$0xff]  ;;  %v83_v4 = vld [vmem:[#allocation5 + $0x10] sm:$0xff]  ;;  %v84_v6 = vld [vmem:[#allocation5 + $0x18] sm:$0xff]  ;;  %vm92_vm1 = vcmask 261120   ;;  %vm186_vm2 = vcmask 523264   ;;  %s620_s28 = smov [#allocation10]  }
  0x4b   :  { %455 = vmatprep.subr.bf16.mxu1 %v617_v0  ;;  %427 = vmatprep.mubr.msk.f32.mxu1 %vm618_vm0, %v619_v1  ;;  %v450_v5 = vpack.c.bf16 %v82_v3, %v81_v2  ;;  %v453_v7 = vpack.c.bf16 %v84_v6, %v83_v4  ;;  %v80_v8 = vld [vmem:[#allocation2] sm:$0xff]  ;;  %v171_v9 = vld [vmem:[#allocation7] sm:$0xff]  ;;  %v172_v10 = vld [vmem:[#allocation7 + $0x8] sm:$0xff]  ;;  %s360_s29 = sshll.u32 %s620_s28, 4  ;;  %s361_s29 = int_to_ptr.vmem [resolvable:$true] %s360_s29 }
  0x4c   :  { %v456_v11 = vpack.c.bf16 %v172_v10, %v171_v9  ;;  %v173_v12 = vld [vmem:[#allocation7 + $0x10] sm:$0xff]  ;;  %v174_v13 = vld [vmem:[#allocation7 + $0x18] sm:$0xff]  ;;  %v175_v15 = vld [vmem:[#allocation7 + $0x20] sm:$0xff]  ;;  %p586_p5 = scmp.lt.s32.totalorder %s361_s29, %s361_s29 }
  0x4d   :  { %451 = vmatpush3.bf16.msra.mxu0 %v450_v5  ;;  %v459_v14 = vpack.c.bf16 %v174_v13, %v173_v12  ;;  %v176_v16 = vld [vmem:[#allocation7 + $0x28] sm:$0xff]  ;;  %v177_v18 = vld [vmem:[#allocation7 + $0x30] sm:$0xff]  ;;  %v178_v19 = vld [vmem:[#allocation7 + $0x38] sm:$0xff] }
  0x4e   :  { %452 = vmatprep.subr.bf16.mxu0 %v617_v0  ;;  %457 = vmatpush3.bf16.msra.mxu1 %v456_v11  ;;  %v462_v17 = vpack.c.bf16 %v176_v16, %v175_v15  ;;  %v465_v20 = vpack.c.bf16 %v178_v19, %v177_v18  ;;  %v371_v21 = vld [vmem:[%s756_s2] ss:$0 sm:$0xff]  ;;  %v265_v30 = vld [vmem:[#allocation8] sm:$0xff]  ;;  %v266_v31 = vld [vmem:[#allocation8 + $0x8] sm:$0xff] }
  0x4f   :  { %458 = vmatprep.subr.bf16.mxu1 %v617_v0  ;;  %v468_v32 = vpack.c.bf16 %v266_v31, %v265_v30  ;;  %v267_v33 = vld [vmem:[#allocation8 + $0x10] sm:$0xff]  ;;  %v268_v34 = vld [vmem:[#allocation8 + $0x18] sm:$0xff]  ;;  %v269_v36 = vld [vmem:[#allocation8 + $0x20] sm:$0xff] }
  0x50   :  { %v471_v35 = vpack.c.bf16 %v268_v34, %v267_v33  ;;  %v270_v37 = vld [vmem:[#allocation8 + $0x28] sm:$0xff]  ;;  %v271_v39 = vld [vmem:[#allocation8 + $0x30] sm:$0xff]  ;;  %v272_v40 = vld [vmem:[#allocation8 + $0x38] sm:$0xff] }
  0x51   :  { %454 = vmatpush3.bf16.msra.mxu0 %v453_v7  ;;  %v474_v38 = vpack.c.bf16 %v270_v37, %v269_v36  ;;  %v477_v41 = vpack.c.bf16 %v272_v40, %v271_v39  ;;  %v373_v42 = vld [vmem:[%s758_s4] ss:$0 sm:$0xff]  ;;  %s581_s4 = scalar_lea.vmem %s361_s29, 128 }
  0x52   :  { %467 = vmatprep.subr.bf16.mxu0 %v617_v0  ;;  %460 = vmatpush3.bf16.msra.mxu1 %v459_v14  ;;  %v375_v51 = vld [vmem:[%s760_s6] ss:$0 sm:$0xff]  ;;  %p582_p4 = scmp.ne.s32.totalorder %s361_s29, %s581_s4  ;;  %p587_p6 = scmp.lt.s32.totalorder %s581_s4, %s581_s4 }
  0x53   :  { %461 = vmatprep.subr.bf16.mxu1 %v617_v0 }
  0x54   :  { %409 = vmatmul.mubr.msk.f32.vlgmr.msra.gmra.mrb[0].mxu0 %vm92_vm1, %v80_v8  ;;  %p588_p7 = por %p587_p6, %p586_p5 }
  0x55   :  { %446 = vmatprep.mubr.msk.f32.mxu0 %vm618_vm0, %v619_v1  ;;  %469 = vmatpush3.bf16.msra.mxu0 %v468_v32 }
  0x56   :  { %463 = vmatpush3.bf16.msra.mxu1 %v462_v17  ;;  %470 = vmatprep.subr.bf16.mxu0 %v617_v0  ;;  %p589_p8 = pnand %p588_p7, %p582_p4 }
  0x57   :  { %464 = vmatprep.subr.bf16.mxu1 %v617_v0 }
  0x59   :  { %472 = vmatpush3.bf16.msra.mxu0 %v471_v35 }
  0x5a   :  { %466 = vmatpush3.bf16.msra.mxu1 %v465_v20  ;;  %473 = vmatprep.subr.bf16.mxu0 %v617_v0 }
  0x5d   :  { %475 = vmatpush3.bf16.msra.mxu0 %v474_v38 }
  0x5e   :  { %476 = vmatprep.subr.bf16.mxu0 %v617_v0 }
  0x61   :  { %478 = vmatpush3.bf16.msra.mxu0 %v477_v41 }
 0x127   :  { %v162_v22 = vpop.f32.mrb[0].mxu0 }
 0x128   :  { %v163_v23 = vadd.f32 %v371_v21, %v162_v22  ;;  %v410_v24 = vpop.f32.mrb[1].mxu0 }
 0x12a   :  { %v167_v25 = vmul.f32 0.70710677, %v163_v23  ;;  %v166_v27 = vmul.f32 0.5, %v163_v23 }
 0x12c   :  { %489 = verf.f32 %v167_v25 }
 0x136   :  { %v490_v26 = vpop.eup %489 }
 0x137   :  { %v169_v28 = vadd.f32 1.0, %v490_v26 }
 0x139   :  { %v170_v29 = vmul.f32 %v169_v28, %v166_v27 }
 0x13b   :  { %428 = vmatmul.mubr.msk.f32.vlgmr.msra.gmra.mrb[0].mxu1 %vm186_vm2, %v170_v29 }
 0x20e   :  { %v256_v43 = vpop.f32.mrb[0].mxu1 }
 0x20f   :  { %v257_v44 = vadd.f32 %v373_v42, %v256_v43  ;;  %v429_v45 = vpop.f32.mrb[1].mxu1 }
 0x211   :  { %v261_v46 = vmul.f32 0.70710677, %v257_v44  ;;  %v260_v48 = vmul.f32 0.5, %v257_v44 }
 0x213   :  { %491 = verf.f32 %v261_v46 }
 0x21d   :  { %v492_v47 = vpop.eup %491 }
 0x21e   :  { %v263_v49 = vadd.f32 1.0, %v492_v47 }
 0x220   :  { %v264_v50 = vmul.f32 %v263_v49, %v260_v48 }
 0x222   :  { %447 = vmatmul.mubr.msk.f32.vlgmr.msra.gmra.mrb[2].mxu0 %vm186_vm2, %v264_v50 }
 0x2f5   :  { %v349_v52 = vpop.f32.mrb[2].mxu0 }
 0x2f6   :  { %v350_v53 = vadd.f32 %v375_v51, %v349_v52  ;;  %v448_v54 = vpop.f32.mrb[3].mxu0 }
 0x2f8   :  { %353 = vst [vmem:[#allocation10] sm:$0xff] %v350_v53 }
 0x2f9   :  { %592 = shalt.err (!%p589_p8)
}
 0x2fa   :  { %s593_s9 = scalar_lea.hbm %s761_s7, 128 }
 0x2fb   :  { %p594_p9 = scmp.ne.s32.totalorder %s761_s7, %s593_s9  ;;  %p597_p10 = scmp.lt.u32.totalorder %s593_s9, %s761_s7 }
 0x2fd   :  { %p599_p11 = pnand %p597_p10, %p594_p9 }
 0x2ff   :  { %602 = shalt.err (!%p599_p11)
}
 0x300   :  { %363 = dma.vmem_to_hbm [thread:$0]  %s361_s29, 128, %s761_s7, [#allocation4]  }
 0x301   :  { %609 = dma.done.wait [#allocation4], 128  }
 0x302   :  { %610 = vsyncadd [#allocation4], 4294967168 }
 0x303   :  { %367 = vsyncpa [#allocation3], 1 }
 0x304   :  { %368 = vsyncpa [#allocation6], 1 }
 0x305   :  { %369 = vsyncpa [#allocation9], 1 }
 0x306   :  { %370 = vsyncpa [#allocation4], 1 }

</bundles_post_ra>
